<compile_context>
chip_gen: v6e
topology: v6e:2x2x1
jax: 0.10.0
libtpu: 0.0.40
codegen_flags: <defaults>
</compile_context>

<pallas_src>
import functools

import jax
import jax.numpy as jnp
from jax.experimental import pallas as pl
from jax.experimental.pallas import tpu as pltpu

_LANE = 128             # vreg lane width: keeps every load/store lane-dense
_MAX_BLOCK_ROWS = 4096  # 4096 x 128 x 4 B = 2 MiB f32 per block (per operand)


def _round_up(a, b):
    return -(-a // b) * b


def _choose_block_rows(rows):
    """Single full-extent block for small inputs; otherwise split into >= 2
    blocks (multiple of 8 sublanes) so the grid can shard across the two v7x
    TensorCores, capped at 2 MiB/block."""
    if rows <= 512:
        return max(rows, 1)
    half = _round_up(-(-rows // 2), 8)
    return min(_MAX_BLOCK_ROWS, half)


def _sin_pi_kernel(x_ref, o_ref):
    # Minimal elementwise body: sin(pi * x) on a lane-dense (block_rows, 128)
    # tile.  Compute stays f32 (v5e VPU has no bf16); the casts below are
    # trace-time no-ops when streaming f32, so nothing extra hits the bundle.
    x = x_ref[...]
    if x.dtype != jnp.float32:
        x = x.astype(jnp.float32)
    y = jnp.sin(x * jnp.pi)
    o_ref[...] = y if y.dtype == o_ref.dtype else y.astype(o_ref.dtype)


def pack_coords_major(columns, dtype=jnp.float32):
    """One-time layout plumbing (done upstream at data-construction time, NOT
    per forward call).  Takes a sequence of flat [N] coordinate arrays
    (struct-of-arrays) and packs them into a lane-dense coords-major slab of
    shape (num_labels, rows_pad, 128), zero-padded so rows_pad is an exact
    multiple of the chosen block size.

    Returns (coords_slab, n, block_rows)."""
    n = int(columns[0].shape[0])
    rows = -(-n // _LANE)
    block_rows = _choose_block_rows(rows)
    rows_pad = _round_up(rows, block_rows)
    n_pad = rows_pad * _LANE
    slabs = [
        jnp.pad(c.astype(dtype).reshape(-1), (0, n_pad - n)).reshape(rows_pad, _LANE)
        for c in columns
    ]
    return jnp.stack(slabs, axis=0), n, block_rows


def my_feature_forward(coords, labels=("x", "t"), *, block_rows=None):
    """
    Mirrors the PyTorch module on a coords-major slab:
      - `extract(['x'])` -> index_map pick of the 'x' row (no data movement)
      - sin(pi * .)      -> lane-dense streaming Pallas kernel (1 read + 1 write)

    coords: (num_labels, rows_pad, 128) lane-dense coords-major slab.
    Returns the padded lane-dense (rows_pad, 128) slab carrying the payload
    that would be labeled 'sin(x)'.  Slice to [N, 1] only once at the very end
    of the model.

    # TODO(synk): LabelTensor label bookkeeping ('sin(x)') has no Pallas/JAX
    # equivalent; only the numeric payload is produced.
    """
    num_labels, rows_pad, lane = coords.shape
    assert lane == _LANE, "coords slab must be lane-dense (last dim = 128)"
    x_idx = labels.index("x")

    if block_rows is None:
        block_rows = _choose_block_rows(rows_pad)
    assert rows_pad % block_rows == 0, "packer guarantees exact block multiple"
    grid = (rows_pad // block_rows,)

    return pl.pallas_call(
        _sin_pi_kernel,
        out_shape=jax.ShapeDtypeStruct((rows_pad, _LANE), coords.dtype),
        grid=grid,
        in_specs=[
            # Leading dim squeezed: the 'extract x' is just this index pick.
            pl.BlockSpec((None, block_rows, _LANE), lambda i: (x_idx, i, 0)),
        ],
        out_specs=pl.BlockSpec((block_rows, _LANE), lambda i: (i, 0)),
        compiler_params=pltpu.CompilerParams(
            dimension_semantics=("parallel",),  # shards grid across v7x's 2 TCs
        ),
    )(coords)


if __name__ == "__main__":
    key = jax.random.PRNGKey(0)
    N = 1024                      # number of collocation points
    labels = ("x", "t")           # labeled coordinates, as in a CausalPINN setup

    # Struct-of-arrays coordinate storage (recommended layout): one flat [N]
    # buffer per label, packed once into the coords-major lane-dense slab.
    kx, kt = jax.random.split(key)
    x_col = jax.random.uniform(kx, (N,), dtype=jnp.float32)
    t_col = jax.random.uniform(kt, (N,), dtype=jnp.float32)

    coords, n, block_rows = pack_coords_major([x_col, t_col], dtype=jnp.float32)

    fwd = jax.jit(
        functools.partial(my_feature_forward, labels=labels, block_rows=block_rows)
    )
    out_slab = fwd(coords)
    out_slab = jax.block_until_ready(out_slab)

    # Slice back to the [N, 1] labeled-tensor payload ONCE, at the very end.
    out = out_slab.reshape(-1)[:n][:, None]

    # correctness check against plain JAX reference
    ref = jnp.sin(x_col * jnp.pi)[:, None]
    assert out.shape == (N, 1)
    assert jnp.allclose(out, ref, atol=1e-5, rtol=1e-5)

    print("KERNEL_OK")
</pallas_src>

<mosaic_0001>
module attributes {stable_mosaic.version = 11 : i64} {
  func.func @_sin_pi_kernel(%arg0: i32, %arg1: memref<1x8x128xf32, #tpu.memory_space<vmem>>, %arg2: memref<8x128xf32, #tpu.memory_space<vmem>>) attributes {dimension_semantics = [#tpu.dimension_semantics<parallel>], iteration_bounds = array<i64: 1>, scalar_prefetch = 0 : i64, scratch_operands = 0 : i64, tpu.core_type = #tpu.core_type<tc>, window_params = [{transform_indices = @transform_0, window_bounds = array<i64: 1, 8, 128>}, {transform_indices = @transform_1, window_bounds = array<i64: 8, 128>}]} {
    %c0 = arith.constant 0 : index
    %c0_0 = arith.constant 0 : index
    %c0_1 = arith.constant 0 : index
    %0 = vector.load %arg1[%c0, %c0_0, %c0_1] : memref<1x8x128xf32, #tpu.memory_space<vmem>>, vector<1x8x128xf32>
    %1 = vector.shape_cast %0 : vector<1x8x128xf32> to vector<8x128xf32>
    %cst = arith.constant 3.14159274 : f32
    %2 = vector.broadcast %cst : f32 to vector<8x128xf32>
    %3 = arith.mulf %1, %2 : vector<8x128xf32>
    %4 = math.sin %3 : vector<8x128xf32>
    %c0_2 = arith.constant 0 : index
    %c0_3 = arith.constant 0 : index
    %5 = vector.load %arg2[%c0_2, %c0_3] : memref<8x128xf32, #tpu.memory_space<vmem>>, vector<8x128xf32>
    tpu.vector_store %arg2[%c0_2, %c0_3], %4 {strides = array<i32>} : memref<8x128xf32, #tpu.memory_space<vmem>>, vector<8x128xf32>,
    return
  }
  func.func @transform_0(%arg0: i32) -> (i32, i32, i32) {
    %c0_i32 = arith.constant 0 : i32
    %c0_i32_0 = arith.constant 0 : i32
    %c0_i32_1 = arith.constant 0 : i32
    return %c0_i32, %arg0, %c0_i32_0 : i32, i32, i32
  }
  func.func @transform_1(%arg0: i32) -> (i32, i32) {
    %c0_i32 = arith.constant 0 : i32
    %c0_i32_0 = arith.constant 0 : i32
    return %arg0, %c0_i32 : i32, i32
  }
}

</mosaic_0001>

<bundles_post_ra>
// kernel: my_feature_forward.1
= control target key start
LH: loop header
LB: loop body
LE: loop exit
PB: predicated region body
PF: predicated region fallthrough
CT: control target
= control target key end

     0   :  { %6 = vsyncpa [#allocation3], 0  ;;  %s252_s0 = inlined_call_operand.hbm [shape: f32[2,8,128], index: 0, kind: input, shape index: {}]   ;;  %s253_s1 = inlined_call_operand.hbm [shape: f32[8,128], index: 1, kind: output, shape index: {}]  }
   0x1   :  { %7 = vsyncpa [#allocation4], 0  ;;  %s207_s6 = smov [#allocation2]  }
   0x2   :  { %s14_s7 = sshll.u32 %s207_s6, 4  ;;  %s15_s7 = int_to_ptr.vmem [resolvable:$true] %s14_s7 }
   0x3   :  { %s171_s8 = scalar_lea.vmem %s15_s7, 128  ;;  %p176_p1 = scmp.lt.s32.totalorder %s15_s7, %s15_s7 }
   0x4   :  { %p172_p0 = scmp.ne.s32.totalorder %s15_s7, %s171_s8  ;;  %p177_p2 = scmp.lt.s32.totalorder %s171_s8, %s171_s8 }
   0x6   :  { %p178_p3 = por %p177_p2, %p176_p1 }
   0x8   :  { %p179_p4 = pnand %p178_p3, %p172_p0 }
   0xa   :  { %182 = shalt.err (!%p179_p4)
}
   0xb   :  { %17 = dma.hbm_to_vmem [thread:$0]  %s252_s0, 128, %s15_s7, [#allocation3]  }
   0xc   :  { %203 = dma.done.wait [#allocation3], 128  }
   0xd   :  { %204 = vsyncadd [#allocation3], 4294967168  ;;  %v21_v0 = vld [vmem:[#allocation2] sm:$0xff]  ;;  %v208_v13 = vmov 683565275   ;;  %s214_s0 = smov [#allocation5]  }
   0xe   :  { %v228_v1 = vmul.f32 3.1415927, %v21_v0  ;;  %v209_v15 = vmov 2475754826   ;;  %v210_v17 = vmov 2131351028  }
   0xf   :  { %v211_v19 = vmov 2102212464   ;;  %v212_v21 = vmov 920167782   ;;  %v213_v28 = vmov 1326507024  }
  0x10   :  { %v26_v2 = vand.u32 2139095040, %v228_v1  ;;  %v23_v4 = vand.u32 2147483647, %v228_v1  ;;  %vm25_vm7 = vcmp.lt.s32.totalorder %v228_v1, 0  ;;  %s134_s11 = sshll.u32 %s214_s0, 4  ;;  %vm115_vm12 = vweird.f32 %v228_v1  ;;  %s135_s11 = int_to_ptr.vmem [resolvable:$true] %s134_s11 }
  0x11   :  { %s183_s12 = scalar_lea.vmem %s135_s11, 128  ;;  %p188_p6 = scmp.lt.s32.totalorder %s135_s11, %s135_s11 }
  0x12   :  { %v27_v3 = vshrl.u32 %v26_v2, 23  ;;  %v30_v7 = vand.u32 8388607, %v23_v4  ;;  %vm24_vm8 = vcmp.le.f32.partialorder %v23_v4, 0.7853982  ;;  %p184_p5 = scmp.ne.s32.totalorder %s135_s11, %s183_s12  ;;  %p189_p7 = scmp.lt.s32.totalorder %s183_s12, %s183_s12 }
  0x14   :  { %v143_v5 = vadd.s32 4294967169, %v27_v3  ;;  %v31_v10 = vor.u32 8388608, %v30_v7  ;;  %p190_p8 = por %p189_p7, %p188_p6 }
  0x16   :  { %v33_v6 = vadd.s32 1, %v143_v5  ;;  %v71_v30 = vshll.u32 %v31_v10, 8  ;;  %p191_p9 = pnand %p190_p8, %p184_p5 }
  0x18   :  { %vm34_vm0 = vcmp.gt.s32.totalorder %v33_v6, 0 }
  0x19   :  { %v35_v8 = vsel %vm34_vm0, %v33_v6, 0 }
  0x1a   :  { %v37_v9 = vand.u32 31, %v35_v8  ;;  %v36_v11 = vshrl.u32 %v35_v8, 5 }
  0x1c   :  { %v38_v12 = vsub.s32 32, %v37_v9  ;;  %v40_v14 = vshll.u32 %v208_v13, %v37_v9  ;;  %v43_v16 = vshll.u32 %v209_v15, %v37_v9  ;;  %v46_v18 = vshll.u32 %v210_v17, %v37_v9 }
  0x1d   :  { %v49_v20 = vshll.u32 %v211_v19, %v37_v9  ;;  %v52_v22 = vshll.u32 %v212_v21, %v37_v9  ;;  %vm55_vm1 = vcmp.lt.s32.totalorder %v36_v11, 1  ;;  %vm58_vm2 = vcmp.lt.s32.totalorder %v36_v11, 4 }
  0x1e   :  { %v39_v23 = vshrl.u32 %v208_v13, %v38_v12  ;;  %v41_v24 = vshrl.u32 %v209_v15, %v38_v12  ;;  %v44_v25 = vshrl.u32 %v210_v17, %v38_v12  ;;  %v47_v26 = vshrl.u32 %v211_v19, %v38_v12 }
  0x1f   :  { %v50_v27 = vshrl.u32 %v212_v21, %v38_v12  ;;  %v53_v29 = vshrl.u32 %v213_v28, %v38_v12  ;;  %vm56_vm3 = vcmp.lt.s32.totalorder %v36_v11, 2  ;;  %vm57_vm4 = vcmp.lt.s32.totalorder %v36_v11, 3 }
  0x20   :  { %v42_v31 = vor.u32 %v41_v24, %v40_v14  ;;  %v45_v32 = vor.u32 %v44_v25, %v43_v16  ;;  %v48_v33 = vor.u32 %v47_v26, %v46_v18 }
  0x21   :  { %v51_v34 = vor.u32 %v50_v27, %v49_v20  ;;  %v54_v35 = vor.u32 %v53_v29, %v52_v22 }
  0x22   :  { %v59_v36 = vsel %vm55_vm1, %v39_v23, %v42_v31  ;;  %v60_v37 = vsel %vm58_vm2, %v48_v33, 2102212464  ;;  %v63_v38 = vsel %vm55_vm1, %v42_v31, %v45_v32  ;;  %v67_v39 = vsel %vm55_vm1, %v45_v32, %v48_v33 }
  0x23   :  { %v61_v40 = vsel %vm57_vm4, %v45_v32, %v60_v37  ;;  %v64_v41 = vsel %vm58_vm2, %v51_v34, 920167782  ;;  %v68_v42 = vsel %vm58_vm2, %v54_v35, 1326507024 }
  0x24   :  { %v65_v43 = vsel %vm57_vm4, %v48_v33, %v64_v41  ;;  %v69_v44 = vsel %vm57_vm4, %v51_v34, %v68_v42  ;;  %v62_v45 = vsel %vm56_vm3, %v59_v36, %v61_v40 }
  0x25   :  { %v66_v46 = vsel %vm56_vm3, %v63_v38, %v65_v43  ;;  %v70_v47 = vsel %vm56_vm3, %v67_v39, %v69_v44  ;;  %v78_v52 = vmul.u32 %v71_v30, %v62_v45 }
  0x26   :  { %v234_v48 = vmul.u32.u64.low %v71_v30, %v70_v47  ;;  %v235_v49 = vmul.u32.u64.high %v71_v30, %v70_v47, %v234_v48  ;;  %v237_v50 = vmul.u32.u64.low %v71_v30, %v66_v46  ;;  %v238_v51 = vmul.u32.u64.high %v71_v30, %v66_v46, %v237_v50 }
  0x28   :  { %vm80_vm5 = vc.u32 %v235_v49, %v237_v50  ;;  %v81_v53 = vadd.s32 1, %v238_v51  ;;  %v79_v0 = vadd.s32 %v237_v50, %v235_v49 }
  0x2a   :  { %v82_v54 = vsel %vm80_vm5, %v81_v53, %v238_v51 }
  0x2b   :  { %v83_v55 = vadd.s32 %v82_v54, %v78_v52 }
  0x2d   :  { %v84_v56 = vadd.s32 536870912, %v83_v55 }
  0x2f   :  { %v85_v57 = vshrl.u32 %v84_v56, 30 }
  0x31   :  { %v86_v58 = vshll.u32 %v85_v57, 30  ;;  %v109_v15 = vsub.s32 4, %v85_v57 }
  0x33   :  { %v87_v59 = vsub.s32 %v83_v55, %v86_v58  ;;  %v110_v18 = vsel %vm25_vm7, %v109_v15, %v85_v57 }
  0x34   :  { %v112_v20 = vsel %vm24_vm8, 0, %v110_v18 }
  0x35   :  { %v89_v60 = vsub.s32 0, %v87_v59  ;;  %v116_v21 = vadd.s32 3, %v112_v20 }
  0x37   :  { %v144_v61 = vmin.u32 %v89_v60, %v87_v59  ;;  %v117_v22 = vand.u32 3, %v116_v21 }
  0x39   :  { %v91_v62 = vclz %v144_v61  ;;  %vm122_vm9 = vcmp.eq.s32.totalorder %v117_v22, 2  ;;  %vm119_vm10 = vcmp.eq.s32.totalorder %v117_v22, 0  ;;  %vm118_vm11 = vcmp.lt.s32.totalorder %v117_v22, 2 }
  0x3b   :  { %v145_v63 = vadd.s32 4294967294, %v91_v62 }
  0x3d   :  { %vm146_vm6 = vcmp.lt.s32.totalorder %v145_v63, 0 }
  0x3e   :  { %v94_v2 = vsel %vm146_vm6, 0, %v145_v63 }
  0x3f   :  { %v95_v3 = vsub.s32 32, %v94_v2  ;;  %v96_v5 = vshll.u32 %v87_v59, %v94_v2  ;;  %v99_v6 = vsub.s32 4294967266, %v94_v2 }
  0x41   :  { %v97_v7 = vshrl.u32 %v79_v0, %v95_v3  ;;  %v100_v8 = vadd.s32 127, %v99_v6 }
  0x43   :  { %v98_v9 = vor.u32 %v97_v7, %v96_v5  ;;  %v101_v10 = vshll.u32 %v100_v8, 23 }
  0x45   :  { %v102_v11 = vor.u32 4788187, %v101_v10  ;;  %v105_v12 = vcvt.s32.f32 %v98_v9 }
  0x47   :  { %v103_v13 = vand.u32 2147483647, %v102_v11 }
  0x49   :  { %v106_v14 = vmul.f32 %v105_v12, %v103_v13 }
  0x4b   :  { %v107_v16 = vxor.u32 2147483648, %v106_v14 }
  0x4d   :  { %v108_v17 = vsel %vm25_vm7, %v107_v16, %v106_v14 }
  0x4e   :  { %v111_v19 = vsel %vm24_vm8, %v228_v1, %v108_v17 }
  0x4f   :  { %159 = vcosq.f32 %v111_v19 }
  0x50   :  { %161 = vsinq.f32 %v111_v19 }
  0x5c   :  { %v160_v23 = vpop.eup %159 }
  0x5d   :  { %v162_v24 = vpop.eup %161  ;;  %v123_v25 = vxor.u32 2147483648, %v160_v23 }
  0x5e   :  { %v120_v26 = vxor.u32 2147483648, %v162_v24 }
  0x5f   :  { %v124_v4 = vsel %vm122_vm9, %v123_v25, %v162_v24 }
  0x60   :  { %v121_v27 = vsel %vm119_vm10, %v160_v23, %v120_v26 }
  0x61   :  { %v125_v28 = vsel %vm118_vm11, %v121_v27, %v124_v4 }
  0x62   :  { %v126_v29 = vsel %vm115_vm12, nan, %v125_v28 }
  0x63   :  { %127 = vst [vmem:[#allocation5] sm:$0xff] %v126_v29 }
  0x64   :  { %194 = shalt.err (!%p191_p9)
}
  0x65   :  { %137 = dma.vmem_to_hbm [thread:$0]  %s135_s11, 128, %s253_s1, [#allocation4]  }
  0x66   :  { %205 = dma.done.wait [#allocation4], 128  }
  0x67   :  { %206 = vsyncadd [#allocation4], 4294967168 }
  0x68   :  { %141 = vsyncpa [#allocation3], 1 }
  0x69   :  { %142 = vsyncpa [#allocation4], 1 }

</bundles_post_ra>
